<compile_context>
chip_gen: v7x
topology: tpu7x:2x2x1
jax: 0.10.0
libtpu: 0.0.40
codegen_flags: <defaults>
</compile_context>

<pallas_src>
import jax
import jax.numpy as jnp
import numpy as np
from jax import lax
from jax.experimental import pallas as pl
from jax.experimental.pallas import tpu as pltpu

# N is a free module-level constant in the PyTorch source; pick a small value.
N = 8                       # width / sequence parameter
C = 4                       # conv channels
H_IN = 5                    # input height: two valid 3x3 convs -> H = 1 (needed by Linear(4N, .))
OUT_F = (N + 1) * N         # 72 output features
LANE = 128                  # lane-dense padded feature width
N_LAYERS = 5

# Per-layer contraction widths (rows of each weight block) and 8-aligned row offsets
# inside the packed bf16 weight slab.
_K1 = H_IN * N              # 40  : flattened (5, N) input plane          -> conv1 Toeplitz
_K2 = 3 * C * N             # 96  : conv1 output features (co*3N + r*N+w) -> conv2
_K3 = C * N                 # 32  : conv2 / conv3 / fc1 features          -> conv3, fc1, fc2
_K = (_K1, _K2, _K3, _K3, _K3)
_W_OFF = (0, _K1, _K1 + _K2, _K1 + _K2 + _K3, _K1 + _K2 + 2 * _K3)
_W_ROWS = _K1 + _K2 + 3 * _K3            # 232 (multiple of 8)
_B_ROWS = 8                              # bias slab rows (5 used, padded to a sublane group)


def _rrm_kernel(x_ref, w_ref, b_ref, out_ref):
    """x_ref: (TB, 40) f32; w_ref: (232, 128) bf16; b_ref: (8, 128) f32; out_ref: (TB, 128) f32."""
    # ---- Layer 1: Conv2d(1, 4, (3,3), padding=(0,1)) + ReLU as one Toeplitz matmul ----
    z = jnp.dot(x_ref[...].astype(jnp.bfloat16),
                w_ref[_W_OFF[0]:_W_OFF[0] + _K[0], :],
                preferred_element_type=jnp.float32) + b_ref[0:1, :]
    h = jnp.maximum(z, 0.0)                                       # (TB, 128), 96 live lanes

    # ---- Layers 2..5: conv2 / wide conv3 / Linear / Linear: one dot each, live-K only ----
    for layer in range(1, N_LAYERS):
        lhs = h[:, :_K[layer]].astype(jnp.bfloat16)               # live lanes only (96 / 32)
        z = jnp.dot(lhs,
                    w_ref[_W_OFF[layer]:_W_OFF[layer] + _K[layer], :],
                    preferred_element_type=jnp.float32) + b_ref[layer:layer + 1, :]
        h = jnp.maximum(z, 0.0)                                   # bias + ReLU in f32

    # TODO(synk): capedActivation() is not defined in the reference source; implemented
    # as a cap at 1.0 (outputs are already >= 0 from the final ReLU).
    out_ref[...] = jnp.minimum(h, 1.0)                            # single lane-dense (TB, 128) store


def prepare_params(params):
    """One-time, host-side rearrangement of the PyTorch-style parameters.

    Returns (w_slab, b_slab):
      w_slab : (232, 128) bf16 — per-layer Toeplitz / dense weight blocks, live-K rows only.
      b_slab : (8, 128)  f32  — one bias row per layer (zero-padded lanes).
    Call once outside the hot path and reuse for every forward call."""
    w1 = np.asarray(params["w1"], np.float32)   # (C, 1, 3, 3)
    b1 = np.asarray(params["b1"], np.float32)
    w2 = np.asarray(params["w2"], np.float32)   # (C, C, 3, 3)
    b2 = np.asarray(params["b2"], np.float32)
    w3 = np.asarray(params["w3"], np.float32)   # (C, C, 1, 2N+1)
    b3 = np.asarray(params["b3"], np.float32)
    w4 = np.asarray(params["w4"], np.float32)   # (4N, 4N)
    b4 = np.asarray(params["b4"], np.float32)
    w5 = np.asarray(params["w5"], np.float32)   # ((N+1)N, 4N)
    b5 = np.asarray(params["b5"], np.float32)

    wslab = np.zeros((_W_ROWS, LANE), np.float32)
    bslab = np.zeros((_B_ROWS, LANE), np.float32)
    W1 = wslab[_W_OFF[0]:_W_OFF[0] + _K[0]]     # views into the slab
    W2 = wslab[_W_OFF[1]:_W_OFF[1] + _K[1]]
    W3 = wslab[_W_OFF[2]:_W_OFF[2] + _K[2]]
    W4 = wslab[_W_OFF[3]:_W_OFF[3] + _K[3]]
    W5 = wslab[_W_OFF[4]:_W_OFF[4] + _K[4]]

    # Feature layouts used inside the kernel:
    #   x_flat  : rin*N + win               (40 cols)
    #   h1_flat : co*3N + r*N + w           (96 cols)  conv1 output (3 rows kept)
    #   h2..h4  : co*N + w / dense features (32 cols)  == torch Flatten order
    #   h5      : (N+1)N = 72 cols

    # Layer 1: Conv2d(1, C, (3,3), padding=(0,1)).
    for co in range(C):
        for r in range(3):                        # output row
            for w in range(N):                    # output col
                col = co * 3 * N + r * N + w
                for kh in range(3):
                    for kw in range(3):
                        wi = w + kw - 1
                        if 0 <= wi < N:
                            W1[(r + kh) * N + wi, col] += w1[co, 0, kh, kw]
        bslab[0, co * 3 * N:(co + 1) * 3 * N] = b1[co]

    # Layer 2: Conv2d(C, C, (3,3), padding=(0,1)) -- output height 1.
    for co in range(C):
        for ci in range(C):
            for kh in range(3):
                for w in range(N):
                    for kw in range(3):
                        wi = w + kw - 1
                        if 0 <= wi < N:
                            W2[ci * 3 * N + kh * N + wi, co * N + w] += w2[co, ci, kh, kw]
        bslab[1, co * N:(co + 1) * N] = b2[co]

    # Layer 3: Conv2d(C, C, (1, 2N+1), padding=(0, N)) -- every output column sees the
    # whole row, so this is exactly a dense 4N x 4N matrix (torch Flatten order).
    for co in range(C):
        for ci in range(C):
            for ow in range(N):
                for iw in range(N):
                    W3[ci * N + iw, co * N + ow] = w3[co, ci, 0, N + iw - ow]
        bslab[2, co * N:(co + 1) * N] = b3[co]

    # Layers 4 / 5: the two Linear layers.
    W4[:4 * N, :4 * N] = w4.T
    bslab[3, :4 * N] = b4
    W5[:4 * N, :OUT_F] = w5.T
    bslab[4, :OUT_F] = b5

    return jnp.asarray(wslab).astype(jnp.bfloat16), jnp.asarray(bslab)


def _pick_tb(bsz):
    """Batch tile: multiple of 8, up to 256 (MXU row fill on v6e/v7x), keeping >= 2
    grid tiles whenever the batch allows so the parallel axis shards across both
    TensorCores on v7x."""
    b8 = max(8, ((bsz + 7) // 8) * 8)
    for tb in (256, 128, 64, 32, 16, 8):
        if b8 >= 2 * tb:
            return tb
    return 8


def rrm_fast_conv_net(x, w_slab, b_slab, *, tb=None):
    """x: (B, 1, H_IN, N) float32 NCHW.  (w_slab, b_slab) = prepare_params(params).
    Returns (B, (N+1)*N) float32."""
    bsz = x.shape[0]
    xs = x.reshape(bsz, H_IN * N).astype(jnp.float32)       # flatten the single (5, N) plane -> (B, 40)
    if tb is None:
        tb = _pick_tb(bsz)
    bsz_pad = ((bsz + tb - 1) // tb) * tb
    if bsz_pad != bsz:
        xs = jnp.pad(xs, ((0, bsz_pad - bsz), (0, 0)))      # zero-pad ragged batch tail

    out = pl.pallas_call(
        _rrm_kernel,
        out_shape=jax.ShapeDtypeStruct((bsz_pad, LANE), jnp.float32),
        grid=(bsz_pad // tb,),
        in_specs=[
            pl.BlockSpec((tb, H_IN * N), lambda i: (i, 0)),          # flat input batch tile
            pl.BlockSpec((_W_ROWS, LANE), lambda i: (0, 0)),         # packed bf16 weights (resident)
            pl.BlockSpec((_B_ROWS, LANE), lambda i: (0, 0)),         # f32 bias rows (resident)
        ],
        out_specs=pl.BlockSpec((tb, LANE), lambda i: (i, 0)),        # lane-dense output tile
        compiler_params=pltpu.CompilerParams(
            dimension_semantics=("parallel",)),                      # batch tiles use both TCs on v7x
    )(xs, w_slab, b_slab)
    return out[:bsz, :OUT_F]                                         # (B, 72)


def init_params(key):
    ks = jax.random.split(key, 10)

    def u(k, shape, fan_in):
        bound = 1.0 / float(np.sqrt(fan_in))
        return jax.random.uniform(k, shape, jnp.float32, -bound, bound)

    return {
        "w1": u(ks[0], (C, 1, 3, 3), 1 * 3 * 3),
        "b1": u(ks[1], (C,), 1 * 3 * 3),
        "w2": u(ks[2], (C, C, 3, 3), C * 3 * 3),
        "b2": u(ks[3], (C,), C * 3 * 3),
        "w3": u(ks[4], (C, C, 1, 2 * N + 1), C * (2 * N + 1)),
        "b3": u(ks[5], (C,), C * (2 * N + 1)),
        "w4": u(ks[6], (4 * N, 4 * N), 4 * N),
        "b4": u(ks[7], (4 * N,), 4 * N),
        "w5": u(ks[8], ((N + 1) * N, 4 * N), 4 * N),
        "b5": u(ks[9], ((N + 1) * N,), 4 * N),
    }


def _ref_forward(x, params, matmul_dtype=jnp.float32):
    """Pure-JAX reference.  With matmul_dtype=bfloat16 it reproduces the kernel's
    rounding points (bf16 MXU operands, f32 accumulation) for a tight comparison."""
    cast = lambda a: a.astype(matmul_dtype)

    def conv(h, w, b, pad_w):
        y = lax.conv_general_dilated(
            cast(h), cast(w), window_strides=(1, 1),
            padding=((0, 0), (pad_w, pad_w)),
            dimension_numbers=("NCHW", "OIHW", "NCHW"),
            preferred_element_type=jnp.float32)
        return y + b[None, :, None, None]

    h = jax.nn.relu(conv(x.astype(jnp.float32), params["w1"], params["b1"], 1))
    h = jax.nn.relu(conv(h, params["w2"], params["b2"], 1))
    h = jax.nn.relu(conv(h, params["w3"], params["b3"], N))
    h = h.reshape(h.shape[0], -1)
    h = jax.nn.relu(jnp.dot(cast(h), cast(params["w4"].T),
                            preferred_element_type=jnp.float32) + params["b4"])
    h = jax.nn.relu(jnp.dot(cast(h), cast(params["w5"].T),
                            preferred_element_type=jnp.float32) + params["b5"])
    return jnp.minimum(h, 1.0)


if __name__ == "__main__":
    batch = 64          # small demo batch -> TB=32, two grid tiles (exercises megacore path)
    key = jax.random.PRNGKey(0)
    pkey, xkey = jax.random.split(key)
    params = init_params(pkey)
    x = jax.random.normal(xkey, (batch, 1, H_IN, N), jnp.float32)

    w_slab, b_slab = prepare_params(params)      # one-time weight rearrangement + bf16 pre-cast
    fwd = jax.jit(rrm_fast_conv_net)
    out = jax.block_until_ready(fwd(x, w_slab, b_slab))
    assert out.shape == (batch, OUT_F)

    # Tight check: reference with the same bf16 rounding points as the kernel
    # (validates the conv->matmul rearrangement, packing and layout; residual
    # differences are only f32 accumulation-order / bf16 rounding-boundary effects).
    ref_bf16 = _ref_forward(x, params, jnp.bfloat16)
    np.testing.assert_allclose(np.asarray(out), np.asarray(ref_bf16), rtol=3e-3, atol=3e-3)

    # Loose sanity check against the pure-f32 reference (bf16 MXU operand rounding only).
    ref_f32 = _ref_forward(x, params, jnp.float32)
    np.testing.assert_allclose(np.asarray(out), np.asarray(ref_f32), rtol=2e-2, atol=2e-2)

    print("KERNEL_OK")
</pallas_src>

<mosaic_0001>
module attributes {stable_mosaic.version = 11 : i64} {
  func.func @_rrm_kernel(%arg0: i32, %arg1: memref<32x40xf32, #tpu.memory_space<vmem>>, %arg2: memref<232x128xbf16, #tpu.memory_space<vmem>>, %arg3: memref<8x128xf32, #tpu.memory_space<vmem>>, %arg4: memref<32x128xf32, #tpu.memory_space<vmem>>) attributes {dimension_semantics = [#tpu.dimension_semantics<parallel>], iteration_bounds = array<i64: 2>, scalar_prefetch = 0 : i64, scratch_operands = 0 : i64, tpu.core_type = #tpu.core_type<tc>, window_params = [{transform_indices = @transform_0, window_bounds = array<i64: 32, 40>}, {pipeline_mode = #tpu.pipeline_mode<synchronous>, transform_indices = @transform_1, window_bounds = array<i64: 232, 128>}, {pipeline_mode = #tpu.pipeline_mode<synchronous>, transform_indices = @transform_2, window_bounds = array<i64: 8, 128>}, {transform_indices = @transform_3, window_bounds = array<i64: 32, 128>}]} {
    %c0 = arith.constant 0 : index
    %c0_0 = arith.constant 0 : index
    %0 = vector.load %arg1[%c0, %c0_0] : memref<32x40xf32, #tpu.memory_space<vmem>>, vector<32x40xf32>
    %1 = arith.truncf %0 : vector<32x40xf32> to vector<32x40xbf16>
    %c0_1 = arith.constant 0 : index
    %c0_2 = arith.constant 0 : index
    %2 = vector.load %arg2[%c0_1, %c0_2] : memref<232x128xbf16, #tpu.memory_space<vmem>>, vector<40x128xbf16>
    %cst = arith.constant dense<0.000000e+00> : vector<32x128xf32>
    %3 = tpu.matmul %1, %2, %cst {dimension_numbers = #tpu.dot_dimension_numbers<[1], [0], [0], [1], [0, 0, 1, 1], [], []>} : vector<32x40xbf16>, vector<40x128xbf16>, vector<32x128xf32> -> vector<32x128xf32>
    %c0_3 = arith.constant 0 : index
    %c0_4 = arith.constant 0 : index
    %4 = vector.load %arg3[%c0_3, %c0_4] : memref<8x128xf32, #tpu.memory_space<vmem>>, vector<1x128xf32>
    %5 = vector.broadcast %4 : vector<1x128xf32> to vector<32x128xf32>
    %6 = arith.addf %3, %5 : vector<32x128xf32>
    %cst_5 = arith.constant 0.000000e+00 : f32
    %7 = vector.broadcast %cst_5 : f32 to vector<32x128xf32>
    %8 = arith.maximumf %6, %7 : vector<32x128xf32>
    %9 = vector.extract_strided_slice %8 {offsets = [0, 0], sizes = [32, 96], strides = [1, 1]} : vector<32x128xf32> to vector<32x96xf32>
    %10 = arith.truncf %9 : vector<32x96xf32> to vector<32x96xbf16>
    %c40 = arith.constant 40 : index
    %c0_6 = arith.constant 0 : index
    %11 = vector.load %arg2[%c40, %c0_6] : memref<232x128xbf16, #tpu.memory_space<vmem>>, vector<96x128xbf16>
    %cst_7 = arith.constant dense<0.000000e+00> : vector<32x128xf32>
    %12 = tpu.matmul %10, %11, %cst_7 {dimension_numbers = #tpu.dot_dimension_numbers<[1], [0], [0], [1], [0, 0, 1, 1], [], []>} : vector<32x96xbf16>, vector<96x128xbf16>, vector<32x128xf32> -> vector<32x128xf32>
    %c1 = arith.constant 1 : index
    %c0_8 = arith.constant 0 : index
    %13 = vector.load %arg3[%c1, %c0_8] : memref<8x128xf32, #tpu.memory_space<vmem>>, vector<1x128xf32>
    %14 = vector.broadcast %13 : vector<1x128xf32> to vector<32x128xf32>
    %15 = arith.addf %12, %14 : vector<32x128xf32>
    %cst_9 = arith.constant 0.000000e+00 : f32
    %16 = vector.broadcast %cst_9 : f32 to vector<32x128xf32>
    %17 = arith.maximumf %15, %16 : vector<32x128xf32>
    %18 = vector.extract_strided_slice %17 {offsets = [0, 0], sizes = [32, 32], strides = [1, 1]} : vector<32x128xf32> to vector<32x32xf32>
    %19 = arith.truncf %18 : vector<32x32xf32> to vector<32x32xbf16>
    %c136 = arith.constant 136 : index
    %c0_10 = arith.constant 0 : index
    %20 = vector.load %arg2[%c136, %c0_10] : memref<232x128xbf16, #tpu.memory_space<vmem>>, vector<32x128xbf16>
    %cst_11 = arith.constant dense<0.000000e+00> : vector<32x128xf32>
    %21 = tpu.matmul %19, %20, %cst_11 {dimension_numbers = #tpu.dot_dimension_numbers<[1], [0], [0], [1], [0, 0, 1, 1], [], []>} : vector<32x32xbf16>, vector<32x128xbf16>, vector<32x128xf32> -> vector<32x128xf32>
    %c2 = arith.constant 2 : index
    %c0_12 = arith.constant 0 : index
    %22 = vector.load %arg3[%c2, %c0_12] : memref<8x128xf32, #tpu.memory_space<vmem>>, vector<1x128xf32>
    %23 = vector.broadcast %22 : vector<1x128xf32> to vector<32x128xf32>
    %24 = arith.addf %21, %23 : vector<32x128xf32>
    %cst_13 = arith.constant 0.000000e+00 : f32
    %25 = vector.broadcast %cst_13 : f32 to vector<32x128xf32>
    %26 = arith.maximumf %24, %25 : vector<32x128xf32>
    %27 = vector.extract_strided_slice %26 {offsets = [0, 0], sizes = [32, 32], strides = [1, 1]} : vector<32x128xf32> to vector<32x32xf32>
    %28 = arith.truncf %27 : vector<32x32xf32> to vector<32x32xbf16>
    %c168 = arith.constant 168 : index
    %c0_14 = arith.constant 0 : index
    %29 = vector.load %arg2[%c168, %c0_14] : memref<232x128xbf16, #tpu.memory_space<vmem>>, vector<32x128xbf16>
    %cst_15 = arith.constant dense<0.000000e+00> : vector<32x128xf32>
    %30 = tpu.matmul %28, %29, %cst_15 {dimension_numbers = #tpu.dot_dimension_numbers<[1], [0], [0], [1], [0, 0, 1, 1], [], []>} : vector<32x32xbf16>, vector<32x128xbf16>, vector<32x128xf32> -> vector<32x128xf32>
    %c3 = arith.constant 3 : index
    %c0_16 = arith.constant 0 : index
    %31 = vector.load %arg3[%c3, %c0_16] : memref<8x128xf32, #tpu.memory_space<vmem>>, vector<1x128xf32>
    %32 = vector.broadcast %31 : vector<1x128xf32> to vector<32x128xf32>
    %33 = arith.addf %30, %32 : vector<32x128xf32>
    %cst_17 = arith.constant 0.000000e+00 : f32
    %34 = vector.broadcast %cst_17 : f32 to vector<32x128xf32>
    %35 = arith.maximumf %33, %34 : vector<32x128xf32>
    %36 = vector.extract_strided_slice %35 {offsets = [0, 0], sizes = [32, 32], strides = [1, 1]} : vector<32x128xf32> to vector<32x32xf32>
    %37 = arith.truncf %36 : vector<32x32xf32> to vector<32x32xbf16>
    %c200 = arith.constant 200 : index
    %c0_18 = arith.constant 0 : index
    %38 = vector.load %arg2[%c200, %c0_18] : memref<232x128xbf16, #tpu.memory_space<vmem>>, vector<32x128xbf16>
    %cst_19 = arith.constant dense<0.000000e+00> : vector<32x128xf32>
    %39 = tpu.matmul %37, %38, %cst_19 {dimension_numbers = #tpu.dot_dimension_numbers<[1], [0], [0], [1], [0, 0, 1, 1], [], []>} : vector<32x32xbf16>, vector<32x128xbf16>, vector<32x128xf32> -> vector<32x128xf32>
    %c4 = arith.constant 4 : index
    %c0_20 = arith.constant 0 : index
    %40 = vector.load %arg3[%c4, %c0_20] : memref<8x128xf32, #tpu.memory_space<vmem>>, vector<1x128xf32>
    %41 = vector.broadcast %40 : vector<1x128xf32> to vector<32x128xf32>
    %42 = arith.addf %39, %41 : vector<32x128xf32>
    %cst_21 = arith.constant 0.000000e+00 : f32
    %43 = vector.broadcast %cst_21 : f32 to vector<32x128xf32>
    %44 = arith.maximumf %42, %43 : vector<32x128xf32>
    %cst_22 = arith.constant 1.000000e+00 : f32
    %45 = vector.broadcast %cst_22 : f32 to vector<32x128xf32>
    %46 = arith.minimumf %44, %45 : vector<32x128xf32>
    %c0_23 = arith.constant 0 : index
    %c0_24 = arith.constant 0 : index
    %47 = vector.load %arg4[%c0_23, %c0_24] : memref<32x128xf32, #tpu.memory_space<vmem>>, vector<32x128xf32>
    tpu.vector_store %arg4[%c0_23, %c0_24], %46 {strides = array<i32>} : memref<32x128xf32, #tpu.memory_space<vmem>>, vector<32x128xf32>,
    return
  }
  func.func @transform_0(%arg0: i32) -> (i32, i32) {
    %c0_i32 = arith.constant 0 : i32
    %c0_i32_0 = arith.constant 0 : i32
    return %arg0, %c0_i32 : i32, i32
  }
  func.func @transform_1(%arg0: i32) -> (i32, i32) {
    %c0_i32 = arith.constant 0 : i32
    %c0_i32_0 = arith.constant 0 : i32
    %c0_i32_1 = arith.constant 0 : i32
    return %c0_i32, %c0_i32_0 : i32, i32
  }
  func.func @transform_2(%arg0: i32) -> (i32, i32) {
    %c0_i32 = arith.constant 0 : i32
    %c0_i32_0 = arith.constant 0 : i32
    %c0_i32_1 = arith.constant 0 : i32
    return %c0_i32, %c0_i32_0 : i32, i32
  }
  func.func @transform_3(%arg0: i32) -> (i32, i32) {
    %c0_i32 = arith.constant 0 : i32
    %c0_i32_0 = arith.constant 0 : i32
    return %arg0, %c0_i32 : i32, i32
  }
}

</mosaic_0001>

<bundles_post_ra>
// kernel: rrm_fast_conv_net.1
= control target key start
LH: loop header
LB: loop body
LE: loop exit
PB: predicated region body
PF: predicated region fallthrough
CT: control target
= control target key end

     0   :  { %8 = vsyncpa [#allocation3], 0  ;;  %s1213_s0 = inlined_call_operand.vmem [shape: f32[64,40], index: 0, kind: input, shape index: {}]   ;;  %s1214_s1 = inlined_call_operand.hbm [shape: bf16[232,128], index: 1, kind: input, shape index: {}]   ;;  %s1215_s2 = inlined_call_operand.vmem [shape: f32[8,128], index: 2, kind: input, shape index: {}]   ;;  %s1216_s3 = inlined_call_operand.hbm [shape: f32[64,128], index: 3, kind: output, shape index: {}]  }
   0x1   :  { %9 = vsyncpa [#allocation4], 0 }
   0x2   :  { %11 = vsyncpa [#allocation4 + $0x1], 0  ;;  %s1053_s12 = smov 0   ;;  %s1055_s13 = smov 0  }
   0x3   :  { %s1057_s14 = smov 0   ;;  %s1059_s15 = smov 0  }
   0x4 LB: > { %s1074_s16 = sadd.s32 4294967295, %s1025_s15   ;;  %s741_s17 = sadd.s32 4294967294, %s1025_s15   ;;  %s1025_s15 = sphi %s1059_s15, %s1232_s15   ;;  %s1021_s14 = sphi %s1057_s14, %s1231_s14   ;;  %s1017_s13 = sphi %s1055_s13, %s1230_s13   ;;  %s1013_s12 = sphi %s1053_s12, %s1229_s12  }
   0x5   : > { %s1078_s18 = sadd.s32 1, %s1025_s15   ;;  %s92_s19 = sadd.s32 1, %s1021_s14 }
   0x6   : > { %s89_s20 = ssub.s32 %s1025_s15, %s1078_s18  ;;  %p102_p0 = scmp.ne.s32.totalorder %s1021_s14, %s1017_s13 }
   0x7   : > { %p90_p1 = scmp.eq.s32.totalorder %s89_s20, 0  ;;  %p103_p2 = scmp.eq.s32.totalorder %s1074_s16, 1 }
   0x8   : > { %p108_p3 = scmp.ne.s32.totalorder %s1017_s13, %s1013_s12  ;;  %p109_p4 = scmp.eq.s32.totalorder %s741_s17, 1 }
   0x9   : > { %s1089_s21 = scalar_select %p90_p1, %s1021_s14, %s92_s19  }
   0xa   : > { %p1091_p5 = por %p103_p2, %p102_p0  ;;  %p1095_p6 = por %p109_p4, %p108_p3 }
   0xb   : > { %p742_p7 = scmp.ge.s32.totalorder %s1025_s15, 1  ;;  %p116_p8 = scmp.lt.s32.totalorder %s1025_s15, 3 }
   0xc   : > { %s1220_s22 = scalar_select %p1091_p5, 1, 0 }
   0xd   : > { %s1221_s23 = scalar_select %p1095_p6, 1, 0 }
   0xe   : > { %p1217_p9 = scmp.eq.s32.totalorder %s1074_s16, 0  ;;  %p1102_p10 = pnand %p742_p7, %p116_p8 }
   0xf   : > { %s1027_s25 = smov [#allocation2]   ;;  %s931_s30 = scalar_lea.hbm %s1214_s1, 1856 }
  0x10   : > { %s1222_s24 = scalar_select %p1102_p10, 1, 0 }
  0x11   : > { %s128_s26 = sshll.u32 %s1027_s25, 4  ;;  %p868_p11 = pneg %p1102_p10  ;;  %s129_s26 = int_to_ptr.vmem [resolvable:$true] %s128_s26 }
  0x12   : > { %p932_p13 = scmp.ne.s32.totalorder %s1214_s1, %s931_s30  ;;  %p938_p3 = scmp.lt.u32.totalorder %s931_s30, %s1214_s1 }
  0x13   : > { %p1110_p12 = pnand %p1217_p9, %p868_p11 }
  0x15   : > { %p933_p0 = pneg %p1110_p12 }
  0x17   : > { %p934_p1 = pnand %p933_p0, %p932_p13 }
  0x19   : > { %p935_p2 = pneg %p934_p1 }
  0x1b   : > { %p940_p4 = pnand %p938_p3, %p935_p2 }
  0x1d   : > { %943 = shalt.err (!%p940_p4)
}
  0x1e   : > { %s944_s8 = scalar_lea.vmem %s129_s26, 1856  ;;  %p952_p9 = scmp.lt.s32.totalorder %s129_s26, %s129_s26 }
  0x1f   : > { %p945_p7 = scmp.ne.s32.totalorder %s129_s26, %s944_s8  ;;  %p953_p6 = scmp.lt.s32.totalorder %s944_s8, %s944_s8 }
  0x21   : > { %p947_p8 = pnand %p945_p7, %p933_p0  ;;  %p954_p5 = por %p953_p6, %p952_p9 }
  0x23   : > { %p948_p11 = pneg %p947_p8 }
  0x25   : > { %p955_p10 = pnand %p954_p5, %p948_p11 }
  0x27   : > { %958 = shalt.err (!%p955_p10)
}
  0x28   : > { %s1028_s9 = smov 64   ;;  %s1029_s10 = smov 4  }
  0x29   : > { %871 = dma.hbm_to_vmem [thread:$0]  (!%p1110_p12), %s1214_s1, 1856, %s129_s26, [#allocation3], %s1028_s9, %s1028_s9, %s1029_s10  }
  0x2a   : > { %p1224_p13 = scmp.ne.s32.totalorder %s1222_s24, 0 }
  0x2b   : > { %p1225_p1 = scmp.eq.s32.totalorder (!%p1224_p13), %s1074_s16, 0 }
  0x2c   : > { %156 = sbr.rel (%p1224_p13) target bundleno = 1189 (0x4a5), region = 32 }
  0x33   : > { %1004 = dma.done.wait (%p1225_p1), [#allocation3], 1856   ;;  %p1226_p0 = pmov %p1225_p1 }
  0x34   : > { %s748_s19 = sshll.u32 %s1074_s16, 2  ;;  %v916_v0 = vld [vmem:[#allocation2] sm:$0xff]   ;;  %v917_v1 = vld [vmem:[#allocation2 + $0x8] sm:$0xff]   ;;  %v918_v3 = vld [vmem:[#allocation2 + $0x10] ss:$0 sps:$4 sm:$0xff]   ;;  %vm219_vm0 = vcmask 326656  }
  0x35   : > { %1006 = vsyncadd (%p1226_p0), [#allocation3], 4294965440  ;;  %p181_p5 = scmp.lt.s32.totalorder %s748_s19, 7  ;;  %811 = vmatprep.subr.bf16.mxu0 %v916_v0  ;;  %vm226_vm1 = vcmask 1043456   ;;  %v919_v6 = vld [vmem:[#allocation2 + $0x14] sm:$0xff]   ;;  %v920_v8 = vld [vmem:[#allocation2 + $0x1c] sm:$0xff]  }
  0x36   : > { %812 = vmatpush3.bf16.msra.mxu0 %v916_v0  ;;  %821 = vmatprep.subr.bf16.mxu1 %v919_v6  ;;  %v228_v10 = vsel %vm226_vm1, %v918_v3, 0  ;;  %v921_v11 = vld [vmem:[#allocation2 + $0x24] sm:$0xff]   ;;  %v922_v13 = vld [vmem:[#allocation2 + $0x2c] sm:$0xff]   ;;  %v923_v14 = vld [vmem:[#allocation2 + $0x34] sm:$0xff]   ;;  %vm338_vm2 = vcmask 785408   ;;  %vm421_vm3 = vcmask 261120  }
  0x37   : > { %s1234_s19 = smov (!%p181_p5, %s748_s19), 7  ;;  %813 = vmatprep.subr.bf16.mxu0 %v917_v1  ;;  %822 = vmatpush3.bf16.msra.mxu1 %v919_v6  ;;  %v924_v15 = vld [vmem:[#allocation2 + $0x3c] sm:$0xff]   ;;  %v925_v31 = vld [vmem:[#allocation2 + $0x44] sm:$0xff]   ;;  %v926_v32 = vld [vmem:[#allocation2 + $0x4c] sm:$0xff]   ;;  %s177_s8 = sand.u32 1, %s1017_s13  }
  0x38   : > { %s749_s20 = sshll.u32 %s1234_s19, 3  ;;  %823 = vmatprep.subr.bf16.mxu1 %v920_v8  ;;  %v750_v16 = vld [vmem:[%s1215_s2] ss:$0 sm:$0xff]  ;;  %v756_v33 = vld [vmem:[%s1215_s2 + $0x1] ss:$0 sm:$0xff]  ;;  %v927_v48 = vld [vmem:[#allocation2 + $0x54] sm:$0xff]  }
  0x39   : > { %s184_s28 = scalar_lea.vmem %s1213_s0, %s749_s20  ;;  %v928_v49 = vld [vmem:[#allocation2 + $0x5c] sm:$0xff]   ;;  %s747_s11 = sshll.u32 %s177_s8, 5 }
  0x3a   : > { %v188_v2 = vld [vmem:[%s184_s28] sm:$0xff]  ;;  %v189_v4 = vld [vmem:[%s184_s28 + $0x8] sm:$0xff]  ;;  %v190_v7 = vld [vmem:[%s184_s28 + $0x10] sm:$0xff]  ;;  %814 = vmatpush3.bf16.msra.mxu0 %v917_v1  ;;  %s179_s17 = scalar_lea.vmem [#allocation5], %s747_s11  ;;  %s785_s20 = sshll.u32 %s1074_s16, 9 }
  0x3b   : > { %v192_v5 = vpack.c.bf16 %v189_v4, %v188_v2  ;;  %v191_v9 = vld [vmem:[%s184_s28 + $0x18] sm:$0xff]  ;;  %861 = vmatprep.subr.msk.bf16.mxu0 %vm226_vm1, %v918_v3  ;;  %824 = vmatpush3.bf16.msra.mxu1 %v920_v8  ;;  %v765_v50 = vld [vmem:[%s1215_s2 + $0x2] ss:$0 sm:$0xff]  ;;  %v929_v1 = vld [vmem:[#allocation2 + $0x64] sm:$0xff]   ;;  %s667_s19 = sshll.u32 %s179_s17, 4  ;;  %s1170_s28 = scalar_lea.hbm %s1216_s3, %s785_s20  ;;  %s1165_s19 = int_to_ptr.vmem [resolvable:$true] %s667_s19 }
  0x3c   : > { %v193_v12 = vpack.c.bf16 %v191_v9, %v190_v7  ;;  %825 = vmatprep.subr.bf16.mxu1 %v921_v11  ;;  %v930_v2 = vld [vmem:[#allocation2 + $0x6c] sm:$0xff]   ;;  %v770_v3 = vld [vmem:[%s1215_s2 + $0x3] ss:$0 sm:$0xff]  ;;  %s1172_s16 = scalar_lea.sflag [#allocation4], %s177_s8  ;;  %s959_s24 = scalar_lea.vmem %s1165_s19, 512 }
  0x3d   : > { %817 = vmatprep.mubr.msk.bf16.mxu0 %vm219_vm0, %v192_v5  ;;  %p960_p6 = scmp.ne.s32.totalorder %s1165_s19, %s959_s24  ;;  %p1227_p9 = scmp.ne.s32.totalorder %s1220_s22, 0 }
  0x3e   : > { %816 = vmatpush3.bf16.msra.mxu0 %v228_v10  ;;  %s1030_s26 = smov [#allocation5]  }
  0x3f   : > { %826 = vmatpush3.bf16.msra.mxu1 %v921_v11  ;;  %837 = vmatprep.subr.bf16.mxu0 %v925_v31  ;;  %p961_p10 = pnand %p960_p6, %p1227_p9  ;;  %s963_s29 = sshll.u32 %s1030_s26, 4  ;;  %s964_s29 = int_to_ptr.vmem [resolvable:$false] %s963_s29 }
  0x40   : > { %827 = vmatprep.subr.bf16.mxu1 %v922_v13  ;;  %s965_s30 = scalar_lea.vmem %s964_s29, 1024  ;;  %p966_p2 = scmp.lt.s32.totalorder %s1165_s19, %s964_s29 }
  0x41   : > { %818 = vmatmul.mubr.msk.bf16.vlgmr.msra.gmra.mrb[0].mxu0 %vm219_vm0, %v193_v12  ;;  %p962_p12 = pneg %p961_p10  ;;  %p967_p3 = scmp.lt.s32.totalorder %s965_s30, %s959_s24 }
  0x42   : > { %838 = vmatpush3.bf16.msra.mxu0 %v925_v31 }
  0x43   : > { %828 = vmatpush3.bf16.msra.mxu1 %v922_v13  ;;  %839 = vmatprep.subr.bf16.mxu0 %v926_v32  ;;  %p968_p4 = por %p967_p3, %p966_p2 }
  0x44   : > { %829 = vmatprep.subr.bf16.mxu1 %v923_v14 }
  0x45   : > { %p969_p7 = pnand %p968_p4, %p962_p12 }
  0x46   : > { %840 = vmatpush3.bf16.msra.mxu0 %v926_v32 }
  0x47   : > { %830 = vmatpush3.bf16.msra.mxu1 %v923_v14  ;;  %845 = vmatprep.subr.bf16.mxu0 %v927_v48 }
  0x48   : > { %831 = vmatprep.subr.bf16.mxu1 %v924_v15 }
  0x4b   : > { %832 = vmatpush3.bf16.msra.mxu1 %v924_v15 }
  0x4c   : > { %853 = vmatprep.subr.bf16.mxu1 %v929_v1 }
 0x114   : > { %v819_v17 = vpop.f32.mrb[0].mxu0 }
 0x115   : > { %v273_v18 = vadd.f32 %v819_v17, %v750_v16  ;;  %v264_v19 = vpop.f32.mrb[1].mxu0 }
 0x116   : > { %v265_v20 = vadd.f32 %v750_v16, %v264_v19  ;;  %v820_v21 = vpop.f32.mrb[2].mxu0 }
 0x117   : > { %v276_v22 = vadd.f32 %v820_v21, %v750_v16  ;;  %v267_v23 = vpop.f32.mrb[3].mxu0  ;;  %v281_v25 = vmax.f32 %v273_v18, 0.0  ;;  %v775_v18 = vld [vmem:[%s1215_s2 + $0x4] ss:$0 sm:$0xff] }
 0x118   : > { %v268_v24 = vadd.f32 %v750_v16, %v267_v23  ;;  %v279_v27 = vmax.f32 %v265_v20, 0.0 }
 0x119   : > { %v282_v26 = vmax.f32 %v276_v22, 0.0 }
 0x11a   : > { %v280_v28 = vmax.f32 %v268_v24, 0.0 }
 0x11b   : > { %v284_v29 = vpack.c.bf16 %v282_v26, %v281_v25 }
 0x11c   : > { %v283_v30 = vpack.c.bf16 %v280_v28, %v279_v27 }
 0x11e   : > { %833 = vmatprep.mubr.msk.bf16.mxu1 %vm338_vm2, %v283_v30 }
 0x11f   : > { %834 = vmatmul.mubr.msk.bf16.vlgmr.msra.gmra.mrb[0].mxu1 %vm338_vm2, %v284_v29 }
 0x120   : > { %854 = vmatpush3.bf16.msra.mxu1 %v929_v1 }
 0x121   : > { %855 = vmatprep.subr.bf16.mxu1 %v930_v2 }
 0x124   : > { %856 = vmatpush3.bf16.msra.mxu1 %v930_v2 }
 0x1f2   : > { %v835_v34 = vpop.f32.mrb[0].mxu1 }
 0x1f3   : > { %v388_v35 = vadd.f32 %v835_v34, %v756_v33  ;;  %v379_v36 = vpop.f32.mrb[1].mxu1 }
 0x1f4   : > { %v380_v37 = vadd.f32 %v756_v33, %v379_v36  ;;  %v836_v38 = vpop.f32.mrb[2].mxu1 }
 0x1f5   : > { %v391_v39 = vadd.f32 %v836_v38, %v756_v33  ;;  %v382_v40 = vpop.f32.mrb[3].mxu1  ;;  %v396_v42 = vmax.f32 %v388_v35, 0.0 }
 0x1f6   : > { %v383_v41 = vadd.f32 %v756_v33, %v382_v40  ;;  %v394_v44 = vmax.f32 %v380_v37, 0.0 }
 0x1f7   : > { %v397_v43 = vmax.f32 %v391_v39, 0.0 }
 0x1f8   : > { %v395_v45 = vmax.f32 %v383_v41, 0.0 }
 0x1f9   : > { %v399_v46 = vpack.c.bf16 %v397_v43, %v396_v42 }
 0x1fa   : > { %v398_v47 = vpack.c.bf16 %v395_v45, %v394_v44 }
 0x1fc   : > { %841 = vmatprep.mubr.msk.bf16.mxu0 %vm421_vm3, %v398_v47 }
 0x1fd   : > { %842 = vmatmul.mubr.msk.bf16.vlgmr.msra.gmra.mrb[4].mxu0 %vm421_vm3, %v399_v46 }
 0x1fe   : > { %846 = vmatpush3.bf16.msra.mxu0 %v927_v48 }
 0x1ff   : > { %847 = vmatprep.subr.bf16.mxu0 %v928_v49 }
 0x202   : > { %848 = vmatpush3.bf16.msra.mxu0 %v928_v49 }
 0x2d0   : > { %v843_v51 = vpop.f32.mrb[4].mxu0 }
 0x2d1   : > { %v471_v52 = vadd.f32 %v843_v51, %v765_v50  ;;  %v462_v53 = vpop.f32.mrb[5].mxu0 }
 0x2d2   : > { %v463_v54 = vadd.f32 %v765_v50, %v462_v53  ;;  %v844_v55 = vpop.f32.mrb[6].mxu0 }
 0x2d3   : > { %v474_v56 = vadd.f32 %v844_v55, %v765_v50  ;;  %v465_v57 = vpop.f32.mrb[7].mxu0  ;;  %v479_v59 = vmax.f32 %v471_v52, 0.0 }
 0x2d4   : > { %v466_v58 = vadd.f32 %v765_v50, %v465_v57  ;;  %v477_v61 = vmax.f32 %v463_v54, 0.0 }
 0x2d5   : > { %v480_v60 = vmax.f32 %v474_v56, 0.0 }
 0x2d6   : > { %v478_v62 = vmax.f32 %v466_v58, 0.0 }
 0x2d7   : > { %v482_v63 = vpack.c.bf16 %v480_v60, %v479_v59 }
 0x2d8   : > { %v481_v0 = vpack.c.bf16 %v478_v62, %v477_v61 }
 0x2da   : > { %849 = vmatprep.mubr.msk.bf16.mxu0 %vm421_vm3, %v481_v0 }
 0x2db   : > { %850 = vmatmul.mubr.msk.bf16.vlgmr.msra.gmra.mrb[8].mxu0 %vm421_vm3, %v482_v63 }
 0x3ae   : > { %v851_v4 = vpop.f32.mrb[8].mxu0 }
 0x3af   : > { %v553_v5 = vadd.f32 %v851_v4, %v770_v3  ;;  %v544_v6 = vpop.f32.mrb[9].mxu0 }
 0x3b0   : > { %v545_v7 = vadd.f32 %v770_v3, %v544_v6  ;;  %v852_v8 = vpop.f32.mrb[10].mxu0 }
 0x3b1   : > { %v556_v9 = vadd.f32 %v852_v8, %v770_v3  ;;  %v547_v10 = vpop.f32.mrb[11].mxu0  ;;  %v561_v12 = vmax.f32 %v553_v5, 0.0 }
 0x3b2   : > { %v548_v11 = vadd.f32 %v770_v3, %v547_v10  ;;  %v559_v14 = vmax.f32 %v545_v7, 0.0 }
 0x3b3   : > { %v562_v13 = vmax.f32 %v556_v9, 0.0 }
 0x3b4   : > { %v560_v15 = vmax.f32 %v548_v11, 0.0 }
 0x3b5   : > { %v564_v16 = vpack.c.bf16 %v562_v13, %v561_v12 }
 0x3b6   : > { %v563_v17 = vpack.c.bf16 %v560_v15, %v559_v14 }
 0x3b8   : > { %857 = vmatprep.mubr.msk.bf16.mxu1 %vm421_vm3, %v563_v17 }
 0x3b9   : > { %858 = vmatmul.mubr.msk.bf16.vlgmr.msra.gmra.mrb[4].mxu1 %vm421_vm3, %v564_v16 }
 0x48c   : > { %v859_v19 = vpop.f32.mrb[4].mxu1 }
 0x48d   : > { %v635_v20 = vadd.f32 %v859_v19, %v775_v18  ;;  %v626_v21 = vpop.f32.mrb[5].mxu1 }
 0x48e   : > { %v627_v22 = vadd.f32 %v775_v18, %v626_v21  ;;  %v860_v23 = vpop.f32.mrb[6].mxu1 }
 0x48f   : > { %v643_v24 = vmax.f32 %v635_v20, 0.0  ;;  %v638_v25 = vadd.f32 %v860_v23, %v775_v18  ;;  %v629_v26 = vpop.f32.mrb[7].mxu1 }
 0x490   : > { %v641_v27 = vmax.f32 %v627_v22, 0.0  ;;  %v630_v28 = vadd.f32 %v775_v18, %v629_v26 }
 0x491   : > { %v647_v29 = vmin.f32 %v643_v24, 1.0  ;;  %v644_v30 = vmax.f32 %v638_v25, 0.0 }
 0x492   : > { %v645_v31 = vmin.f32 %v641_v27, 1.0  ;;  %v642_v32 = vmax.f32 %v630_v28, 0.0 }
 0x493   : > { %651 = vst [vmem:[%s179_s17 + $0x10] sm:$0xff] %v647_v29  ;;  %v648_v33 = vmin.f32 %v644_v30, 1.0 }
 0x494   : > { %649 = vst [vmem:[%s179_s17] sm:$0xff] %v645_v31  ;;  %v646_v34 = vmin.f32 %v642_v32, 1.0 }
 0x495   : > { %652 = vst [vmem:[%s179_s17 + $0x18] sm:$0xff] %v648_v33 }
 0x496   : > { %650 = vst [vmem:[%s179_s17 + $0x8] sm:$0xff] %v646_v34 }
 0x497   : > { %972 = shalt.err (!%p969_p7)
}
 0x498   : > { %s973_s4 = scalar_lea.hbm %s1170_s28, 512  ;;  %s977_s7 = scalar_lea.hbm %s1216_s3, 1024 }
 0x499   : > { %p974_p8 = scmp.ne.s32.totalorder %s1170_s28, %s973_s4  ;;  %p978_p1 = scmp.lt.u32.totalorder %s1170_s28, %s1216_s3 }
 0x49a   : > { %p979_p0 = scmp.lt.u32.totalorder %s977_s7, %s973_s4  ;;  %p981_p6 = scmp.lt.u32.totalorder %s973_s4, %s1170_s28 }
 0x49b   : > { %p975_p11 = pnand %p974_p8, %p1227_p9 }
 0x49c   : > { %p980_p5 = por %p979_p0, %p978_p1 }
 0x49d   : > { %p976_p13 = pneg %p975_p11 }
 0x49e   : > { %p982_p10 = por %p981_p6, %p980_p5 }
 0x4a0   : > { %p983_p12 = pnand %p982_p10, %p976_p13 }
 0x4a2   : > { %986 = shalt.err (!%p983_p12)
}
 0x4a3   : > { %s1031_s10 = smov 128   ;;  %s1032_s11 = smov 8  }
 0x4a4   : > { %866 = dma.vmem_to_hbm [thread:$0]  (%p1227_p9), %s1165_s19, 512, %s1170_s28, %s1172_s16, %s1031_s10, %s1031_s10, %s1032_s11  }
 0x4a5 PF: > { %p878_p2 = scmp.ge.s32.totalorder %s1025_s15, 2  ;;  %s682_s17 = sand.u32 1, %s1013_s12  }
 0x4a6   : > { %p1228_p3 = scmp.ne.s32.totalorder %s1221_s23, 0  ;;  %s683_s20 = scalar_lea.sflag [#allocation4], %s682_s17 }
 0x4a8   : > { %p873_p4 = pnand %p878_p2, %p1228_p3 }
 0x4aa   : > { %1008 = dma.done.wait (!%p873_p4), %s683_s20, 512  }
 0x4ab   : > { %1010 = vsyncadd (!%p873_p4), %s683_s20, 4294966784  ;;  %p14_p7 = scmp.ge.s32.totalorder %s1078_s18, 4   ;;  %s1229_s12 = smov %s1017_s13 }
 0x4ac   : > { %s1230_s13 = smov %s1021_s14  ;;  %s1231_s14 = smov %s1089_s21 }
 0x4ad   : > { %s1232_s15 = smov %s1078_s18  ;;  %16 = sbr.rel (!%p14_p7) target bundleno = 4 (0x4), region = 72 }
 0x4b4   :  { %688 = vsyncpa [#allocation3], 1 }
 0x4b5   :  { %690 = vsyncpa [#allocation3 + $0x1], 1 }
 0x4b6   :  { %691 = vsyncpa [#allocation4], 1 }
 0x4b7   :  { %693 = vsyncpa [#allocation4 + $0x1], 1 }

</bundles_post_ra>
